<compile_context>
chip_gen: v7x
topology: tpu7x:2x2x1
jax: 0.10.0
libtpu: 0.0.40
codegen_flags: <defaults>
</compile_context>

<pallas_src>
import jax
import jax.numpy as jnp
from jax import lax
from jax.experimental import pallas as pl
from jax.experimental.pallas import tpu as pltpu


# ---------------------------------------------------------------------------
# Fused Pallas kernel: 3x (GCNConv + ReLU) -> mean pool -> MLP head -> log_softmax
# ---------------------------------------------------------------------------

def _fused_gcn0tpk_kernel(adj_ref, x_ref,
                          w1_ref, b1_ref, w2_ref, b2_ref, w3_ref, b3_ref,
                          wl1_ref, bl1_ref, wl2_ref, bl2_ref,
                          o_ref):
    adj = adj_ref[...]                                   # (bt, N, N) f32 0/1, no self loops
    bt, n, _ = adj.shape

    # Degrees computed once, shared by all three conv layers (adjacency is symmetric,
    # so a single row-sum suffices; no second N^2 reduction, no A+I materialization).
    deg = jnp.sum(adj, axis=2, keepdims=True) + 1.0      # (bt, N, 1)
    dis = lax.rsqrt(deg)                                 # d^-1/2
    dinv = dis * dis                                     # d^-1
    adj_bf = adj.astype(jnp.bfloat16)                    # 0/1 is exact in bf16

    def propagate(h):
        # h: (bt, N, F) f32 -> D^-1/2 (A+I) D^-1/2 h, factored form, f32 out.
        ah = jnp.einsum('bij,bjf->bif', adj_bf,
                        (dis * h).astype(jnp.bfloat16),
                        preferred_element_type=jnp.float32)
        return dis * ah + dinv * h

    def dense_bf16(h2d, w_ref_):
        # folded-batch (bt*N, Fin) @ (Fin, Fout): one MXU call, bf16 in / f32 acc.
        return jnp.dot(h2d.astype(jnp.bfloat16),
                       w_ref_[...].astype(jnp.bfloat16),
                       preferred_element_type=jnp.float32)

    # ---- conv1 + relu : Fin < Fout, so propagate first, then one weight matmul ----
    x = x_ref[...]                                       # (bt, N, Fin) f32
    fin = x.shape[-1]
    h = propagate(x).reshape(bt * n, fin)
    h = jnp.maximum(dense_bf16(h, w1_ref) + b1_ref[...], 0.0)        # (bt*N, H)
    hdim = h.shape[-1]

    # ---- conv2 / conv3 + relu : Fin == Fout, weight matmul first then propagate ----
    for w_ref_, b_ref_ in ((w2_ref, b2_ref), (w3_ref, b3_ref)):
        z = dense_bf16(h, w_ref_).reshape(bt, n, hdim)
        h = jnp.maximum(propagate(z) + b_ref_[...], 0.0).reshape(bt * n, hdim)

    # ---- global_mean_pool + lin1 + relu + lin2 + log_softmax (tiny; kept in f32) ----
    m = jnp.mean(h.reshape(bt, n, hdim), axis=1)                      # (bt, H)
    hh = jnp.maximum(
        jnp.dot(m, wl1_ref[...], preferred_element_type=jnp.float32) + bl1_ref[...],
        0.0)
    logits = jnp.dot(hh, wl2_ref[...], preferred_element_type=jnp.float32) + bl2_ref[...]
    zz = logits - jnp.max(logits, axis=-1, keepdims=True)
    o_ref[0] = zz - jnp.log(jnp.sum(jnp.exp(zz), axis=-1, keepdims=True))


# ---------------------------------------------------------------------------
# Wrapper
# ---------------------------------------------------------------------------

def _largest_divisor_leq(n, cap):
    for d in range(max(1, min(cap, n)), 0, -1):
        if n % d == 0:
            return d
    return 1


def gcn_conv0_tpk_forward(x, adj, params, *, max_graphs_per_block=8):
    """x: (B, N, Fin) node features; adj: (B, N, N) symmetric 0/1, no self-loops."""
    B, N, Fin = x.shape
    C = params["wl2"].shape[1]

    # Fold several graphs per block (bigger MXU tiles, fewer serial grid steps),
    # while keeping >= 2 blocks when B >= 2 so the 'parallel' axis can shard
    # across both TensorCores on v7x.
    cap = min(max_graphs_per_block, B // 2) if B >= 2 else 1
    bt = _largest_divisor_leq(B, cap)
    n_blocks = B // bt

    def wspec(a):
        return pl.BlockSpec(a.shape, lambda i, _nd=a.ndim: (0,) * _nd)

    out3 = pl.pallas_call(
        _fused_gcn0tpk_kernel,
        out_shape=jax.ShapeDtypeStruct((n_blocks, bt, C), jnp.float32),
        grid=(n_blocks,),
        in_specs=[
            pl.BlockSpec((bt, N, N), lambda i: (i, 0, 0)),    # adjacency block
            pl.BlockSpec((bt, N, Fin), lambda i: (i, 0, 0)),  # features block
            wspec(params["w1"]), wspec(params["b1"]),
            wspec(params["w2"]), wspec(params["b2"]),
            wspec(params["w3"]), wspec(params["b3"]),
            wspec(params["wl1"]), wspec(params["bl1"]),
            wspec(params["wl2"]), wspec(params["bl2"]),
        ],
        out_specs=pl.BlockSpec((1, bt, C), lambda i: (i, 0, 0)),
        compiler_params=pltpu.CompilerParams(
            dimension_semantics=("parallel",),
            # Explicit VMEM budget (safe on v5e/v6e/v7x); current blocks use << this.
            vmem_limit_bytes=32 * 1024 * 1024,
        ),
    )(adj, x,
      params["w1"], params["b1"], params["w2"], params["b2"],
      params["w3"], params["b3"],
      params["wl1"], params["bl1"], params["wl2"], params["bl2"])
    return out3.reshape(B, C)


# ---------------------------------------------------------------------------
# Parameter init (deterministic)
# ---------------------------------------------------------------------------

def init_params(key, num_features, output_channels, nb_neurons=128):
    ks = jax.random.split(key, 8)

    def g(k, shape, fan_in):
        return (jax.random.normal(k, shape, jnp.float32) / jnp.sqrt(fan_in)).astype(jnp.float32)

    return {
        "w1": g(ks[0], (num_features, nb_neurons), num_features),
        "b1": jnp.zeros((1, nb_neurons), jnp.float32),
        "w2": g(ks[1], (nb_neurons, nb_neurons), nb_neurons),
        "b2": jnp.zeros((1, nb_neurons), jnp.float32),
        "w3": g(ks[2], (nb_neurons, nb_neurons), nb_neurons),
        "b3": jnp.zeros((1, nb_neurons), jnp.float32),
        "wl1": g(ks[3], (nb_neurons, 64), nb_neurons),
        "bl1": jnp.zeros((1, 64), jnp.float32),
        "wl2": g(ks[4], (64, output_channels), 64),
        "bl2": jnp.zeros((1, output_channels), jnp.float32),
    }


# ---------------------------------------------------------------------------
# Example run
# ---------------------------------------------------------------------------

if __name__ == "__main__":
    B, N = 2, 16                  # 2 graphs, 16 nodes each
    num_features = 16
    output_channels = 4
    nb_neurons = 128

    key = jax.random.PRNGKey(0)
    k_x, k_a, k_p = jax.random.split(key, 3)

    x = jax.random.normal(k_x, (B, N, num_features), jnp.float32)

    # random symmetric 0/1 adjacency, no self loops (dense stand-in for edge_index)
    a = (jax.random.uniform(k_a, (B, N, N)) < 0.3).astype(jnp.float32)
    a = jnp.maximum(a, jnp.swapaxes(a, 1, 2))
    a = a * (1.0 - jnp.eye(N, dtype=jnp.float32)[None])

    params = init_params(k_p, num_features, output_channels, nb_neurons)

    out = gcn_conv0_tpk_forward(x, a, params)
    out = jax.block_until_ready(out)
    assert out.shape == (B, output_channels)
    assert bool(jnp.all(jnp.isfinite(out)))
    # log_softmax rows must sum to 1 in prob space
    assert bool(jnp.all(jnp.abs(jnp.sum(jnp.exp(out), axis=-1) - 1.0) < 1e-3))
    print("KERNEL_OK")
</pallas_src>

<mosaic_0001>
module attributes {stable_mosaic.version = 11 : i64} {
  func.func @_fused_gcn0tpk_kernel(%arg0: i32, %arg1: memref<1x16x16xf32, #tpu.memory_space<vmem>>, %arg2: memref<1x16x16xf32, #tpu.memory_space<vmem>>, %arg3: memref<16x128xf32, #tpu.memory_space<vmem>>, %arg4: memref<1x128xf32, #tpu.memory_space<vmem>>, %arg5: memref<128x128xf32, #tpu.memory_space<vmem>>, %arg6: memref<1x128xf32, #tpu.memory_space<vmem>>, %arg7: memref<128x128xf32, #tpu.memory_space<vmem>>, %arg8: memref<1x128xf32, #tpu.memory_space<vmem>>, %arg9: memref<128x64xf32, #tpu.memory_space<vmem>>, %arg10: memref<1x64xf32, #tpu.memory_space<vmem>>, %arg11: memref<64x4xf32, #tpu.memory_space<vmem>>, %arg12: memref<1x4xf32, #tpu.memory_space<vmem>>, %arg13: memref<1x1x4xf32, #tpu.memory_space<vmem>>) attributes {dimension_semantics = [#tpu.dimension_semantics<parallel>], iteration_bounds = array<i64: 2>, scalar_prefetch = 0 : i64, scratch_operands = 0 : i64, tpu.core_type = #tpu.core_type<tc>, window_params = [{transform_indices = @transform_0, window_bounds = array<i64: 1, 16, 16>}, {transform_indices = @transform_1, window_bounds = array<i64: 1, 16, 16>}, {pipeline_mode = #tpu.pipeline_mode<synchronous>, transform_indices = @transform_2, window_bounds = array<i64: 16, 128>}, {pipeline_mode = #tpu.pipeline_mode<synchronous>, transform_indices = @transform_3, window_bounds = array<i64: 1, 128>}, {pipeline_mode = #tpu.pipeline_mode<synchronous>, transform_indices = @transform_4, window_bounds = array<i64: 128, 128>}, {pipeline_mode = #tpu.pipeline_mode<synchronous>, transform_indices = @transform_5, window_bounds = array<i64: 1, 128>}, {pipeline_mode = #tpu.pipeline_mode<synchronous>, transform_indices = @transform_6, window_bounds = array<i64: 128, 128>}, {pipeline_mode = #tpu.pipeline_mode<synchronous>, transform_indices = @transform_7, window_bounds = array<i64: 1, 128>}, {pipeline_mode = #tpu.pipeline_mode<synchronous>, transform_indices = @transform_8, window_bounds = array<i64: 128, 64>}, {pipeline_mode = #tpu.pipeline_mode<synchronous>, transform_indices = @transform_9, window_bounds = array<i64: 1, 64>}, {pipeline_mode = #tpu.pipeline_mode<synchronous>, transform_indices = @transform_10, window_bounds = array<i64: 64, 4>}, {pipeline_mode = #tpu.pipeline_mode<synchronous>, transform_indices = @transform_11, window_bounds = array<i64: 1, 4>}, {transform_indices = @transform_12, window_bounds = array<i64: 1, 1, 4>}]} {
    %c0 = arith.constant 0 : index
    %c0_0 = arith.constant 0 : index
    %c0_1 = arith.constant 0 : index
    %0 = vector.load %arg1[%c0, %c0_0, %c0_1] : memref<1x16x16xf32, #tpu.memory_space<vmem>>, vector<1x16x16xf32>
    %cst = arith.constant dense<0.000000e+00> : vector<1x16xf32>
    %1 = vector.multi_reduction <add>, %0, %cst [2] : vector<1x16x16xf32> to vector<1x16xf32>
    %2 = vector.shape_cast %1 : vector<1x16xf32> to vector<1x16x1xf32>
    %cst_2 = arith.constant 1.000000e+00 : f32
    %3 = vector.broadcast %cst_2 : f32 to vector<1x16x1xf32>
    %4 = arith.addf %2, %3 : vector<1x16x1xf32>
    %5 = math.rsqrt %4 : vector<1x16x1xf32>
    %6 = arith.mulf %5, %5 : vector<1x16x1xf32>
    %7 = arith.truncf %0 : vector<1x16x16xf32> to vector<1x16x16xbf16>
    %c0_3 = arith.constant 0 : index
    %c0_4 = arith.constant 0 : index
    %c0_5 = arith.constant 0 : index
    %8 = vector.load %arg2[%c0_3, %c0_4, %c0_5] : memref<1x16x16xf32, #tpu.memory_space<vmem>>, vector<1x16x16xf32>
    %9 = vector.broadcast %5 : vector<1x16x1xf32> to vector<1x16x16xf32>
    %10 = arith.mulf %9, %8 : vector<1x16x16xf32>
    %11 = arith.truncf %10 : vector<1x16x16xf32> to vector<1x16x16xbf16>
    "tpu.trace_start"() <{level = 10 : i32, message = "bij,bjf->bif"}> : () -> ()
    %cst_6 = arith.constant dense<0.000000e+00> : vector<1x16x16xf32>
    %12 = tpu.matmul %7, %11, %cst_6 {dimension_numbers = #tpu.dot_dimension_numbers<[2], [1], [1], [2], [0, 0, 0, 1, 1, 2], [0], [0]>} : vector<1x16x16xbf16>, vector<1x16x16xbf16>, vector<1x16x16xf32> -> vector<1x16x16xf32>
    "tpu.trace_stop"() : () -> ()
    %13 = vector.broadcast %5 : vector<1x16x1xf32> to vector<1x16x16xf32>
    %14 = arith.mulf %13, %12 : vector<1x16x16xf32>
    %15 = vector.broadcast %6 : vector<1x16x1xf32> to vector<1x16x16xf32>
    %16 = arith.mulf %15, %8 : vector<1x16x16xf32>
    %17 = arith.addf %14, %16 : vector<1x16x16xf32>
    %18 = vector.shape_cast %17 : vector<1x16x16xf32> to vector<16x16xf32>
    %19 = arith.truncf %18 : vector<16x16xf32> to vector<16x16xbf16>
    %c0_7 = arith.constant 0 : index
    %c0_8 = arith.constant 0 : index
    %20 = vector.load %arg3[%c0_7, %c0_8] : memref<16x128xf32, #tpu.memory_space<vmem>>, vector<16x128xf32>
    %21 = arith.truncf %20 : vector<16x128xf32> to vector<16x128xbf16>
    %cst_9 = arith.constant dense<0.000000e+00> : vector<16x128xf32>
    %22 = tpu.matmul %19, %21, %cst_9 {dimension_numbers = #tpu.dot_dimension_numbers<[1], [0], [0], [1], [0, 0, 1, 1], [], []>} : vector<16x16xbf16>, vector<16x128xbf16>, vector<16x128xf32> -> vector<16x128xf32>
    %c0_10 = arith.constant 0 : index
    %c0_11 = arith.constant 0 : index
    %23 = vector.load %arg4[%c0_10, %c0_11] : memref<1x128xf32, #tpu.memory_space<vmem>>, vector<1x128xf32>
    %24 = vector.broadcast %23 : vector<1x128xf32> to vector<16x128xf32>
    %25 = arith.addf %22, %24 : vector<16x128xf32>
    %cst_12 = arith.constant 0.000000e+00 : f32
    %26 = vector.broadcast %cst_12 : f32 to vector<16x128xf32>
    %27 = arith.maximumf %25, %26 : vector<16x128xf32>
    %28 = arith.truncf %27 : vector<16x128xf32> to vector<16x128xbf16>
    %c0_13 = arith.constant 0 : index
    %c0_14 = arith.constant 0 : index
    %29 = vector.load %arg5[%c0_13, %c0_14] : memref<128x128xf32, #tpu.memory_space<vmem>>, vector<128x128xf32>
    %30 = arith.truncf %29 : vector<128x128xf32> to vector<128x128xbf16>
    %cst_15 = arith.constant dense<0.000000e+00> : vector<16x128xf32>
    %31 = tpu.matmul %28, %30, %cst_15 {dimension_numbers = #tpu.dot_dimension_numbers<[1], [0], [0], [1], [0, 0, 1, 1], [], []>} : vector<16x128xbf16>, vector<128x128xbf16>, vector<16x128xf32> -> vector<16x128xf32>
    %32 = vector.shape_cast %31 : vector<16x128xf32> to vector<1x16x128xf32>
    %33 = vector.broadcast %5 : vector<1x16x1xf32> to vector<1x16x128xf32>
    %34 = arith.mulf %33, %32 : vector<1x16x128xf32>
    %35 = arith.truncf %34 : vector<1x16x128xf32> to vector<1x16x128xbf16>
    "tpu.trace_start"() <{level = 10 : i32, message = "bij,bjf->bif"}> : () -> ()
    %cst_16 = arith.constant dense<0.000000e+00> : vector<1x16x128xf32>
    %36 = tpu.matmul %7, %35, %cst_16 {dimension_numbers = #tpu.dot_dimension_numbers<[2], [1], [1], [2], [0, 0, 0, 1, 1, 2], [0], [0]>} : vector<1x16x16xbf16>, vector<1x16x128xbf16>, vector<1x16x128xf32> -> vector<1x16x128xf32>
    "tpu.trace_stop"() : () -> ()
    %37 = vector.broadcast %5 : vector<1x16x1xf32> to vector<1x16x128xf32>
    %38 = arith.mulf %37, %36 : vector<1x16x128xf32>
    %39 = vector.broadcast %6 : vector<1x16x1xf32> to vector<1x16x128xf32>
    %40 = arith.mulf %39, %32 : vector<1x16x128xf32>
    %41 = arith.addf %38, %40 : vector<1x16x128xf32>
    %c0_17 = arith.constant 0 : index
    %c0_18 = arith.constant 0 : index
    %42 = vector.load %arg6[%c0_17, %c0_18] : memref<1x128xf32, #tpu.memory_space<vmem>>, vector<1x128xf32>
    %43 = vector.shape_cast %42 : vector<1x128xf32> to vector<1x1x128xf32>
    %44 = vector.broadcast %43 : vector<1x1x128xf32> to vector<1x16x128xf32>
    %45 = arith.addf %41, %44 : vector<1x16x128xf32>
    %cst_19 = arith.constant 0.000000e+00 : f32
    %46 = vector.broadcast %cst_19 : f32 to vector<1x16x128xf32>
    %47 = arith.maximumf %45, %46 : vector<1x16x128xf32>
    %48 = vector.shape_cast %47 : vector<1x16x128xf32> to vector<16x128xf32>
    %49 = arith.truncf %48 : vector<16x128xf32> to vector<16x128xbf16>
    %c0_20 = arith.constant 0 : index
    %c0_21 = arith.constant 0 : index
    %50 = vector.load %arg7[%c0_20, %c0_21] : memref<128x128xf32, #tpu.memory_space<vmem>>, vector<128x128xf32>
    %51 = arith.truncf %50 : vector<128x128xf32> to vector<128x128xbf16>
    %cst_22 = arith.constant dense<0.000000e+00> : vector<16x128xf32>
    %52 = tpu.matmul %49, %51, %cst_22 {dimension_numbers = #tpu.dot_dimension_numbers<[1], [0], [0], [1], [0, 0, 1, 1], [], []>} : vector<16x128xbf16>, vector<128x128xbf16>, vector<16x128xf32> -> vector<16x128xf32>
    %53 = vector.shape_cast %52 : vector<16x128xf32> to vector<1x16x128xf32>
    %54 = vector.broadcast %5 : vector<1x16x1xf32> to vector<1x16x128xf32>
    %55 = arith.mulf %54, %53 : vector<1x16x128xf32>
    %56 = arith.truncf %55 : vector<1x16x128xf32> to vector<1x16x128xbf16>
    "tpu.trace_start"() <{level = 10 : i32, message = "bij,bjf->bif"}> : () -> ()
    %cst_23 = arith.constant dense<0.000000e+00> : vector<1x16x128xf32>
    %57 = tpu.matmul %7, %56, %cst_23 {dimension_numbers = #tpu.dot_dimension_numbers<[2], [1], [1], [2], [0, 0, 0, 1, 1, 2], [0], [0]>} : vector<1x16x16xbf16>, vector<1x16x128xbf16>, vector<1x16x128xf32> -> vector<1x16x128xf32>
    "tpu.trace_stop"() : () -> ()
    %58 = vector.broadcast %5 : vector<1x16x1xf32> to vector<1x16x128xf32>
    %59 = arith.mulf %58, %57 : vector<1x16x128xf32>
    %60 = vector.broadcast %6 : vector<1x16x1xf32> to vector<1x16x128xf32>
    %61 = arith.mulf %60, %53 : vector<1x16x128xf32>
    %62 = arith.addf %59, %61 : vector<1x16x128xf32>
    %c0_24 = arith.constant 0 : index
    %c0_25 = arith.constant 0 : index
    %63 = vector.load %arg8[%c0_24, %c0_25] : memref<1x128xf32, #tpu.memory_space<vmem>>, vector<1x128xf32>
    %64 = vector.shape_cast %63 : vector<1x128xf32> to vector<1x1x128xf32>
    %65 = vector.broadcast %64 : vector<1x1x128xf32> to vector<1x16x128xf32>
    %66 = arith.addf %62, %65 : vector<1x16x128xf32>
    %cst_26 = arith.constant 0.000000e+00 : f32
    %67 = vector.broadcast %cst_26 : f32 to vector<1x16x128xf32>
    %68 = arith.maximumf %66, %67 : vector<1x16x128xf32>
    %69 = vector.shape_cast %68 : vector<1x16x128xf32> to vector<16x128xf32>
    %70 = vector.shape_cast %69 : vector<16x128xf32> to vector<1x16x128xf32>
    %cst_27 = arith.constant dense<0.000000e+00> : vector<1x128xf32>
    %71 = vector.multi_reduction <add>, %70, %cst_27 [1] : vector<1x16x128xf32> to vector<1x128xf32>
    %cst_28 = arith.constant 1.600000e+01 : f32
    %72 = vector.broadcast %cst_28 : f32 to vector<1x128xf32>
    %73 = arith.divf %71, %72 : vector<1x128xf32>
    %c0_29 = arith.constant 0 : index
    %c0_30 = arith.constant 0 : index
    %74 = vector.load %arg9[%c0_29, %c0_30] : memref<128x64xf32, #tpu.memory_space<vmem>>, vector<128x64xf32>
    %cst_31 = arith.constant dense<0.000000e+00> : vector<1x64xf32>
    %75 = tpu.matmul %73, %74, %cst_31 {dimension_numbers = #tpu.dot_dimension_numbers<[1], [0], [0], [1], [0, 0, 1, 1], [], []>} : vector<1x128xf32>, vector<128x64xf32>, vector<1x64xf32> -> vector<1x64xf32>
    %c0_32 = arith.constant 0 : index
    %c0_33 = arith.constant 0 : index
    %76 = vector.load %arg10[%c0_32, %c0_33] : memref<1x64xf32, #tpu.memory_space<vmem>>, vector<1x64xf32>
    %77 = arith.addf %75, %76 : vector<1x64xf32>
    %cst_34 = arith.constant 0.000000e+00 : f32
    %78 = vector.broadcast %cst_34 : f32 to vector<1x64xf32>
    %79 = arith.maximumf %77, %78 : vector<1x64xf32>
    %c0_35 = arith.constant 0 : index
    %c0_36 = arith.constant 0 : index
    %80 = vector.load %arg11[%c0_35, %c0_36] : memref<64x4xf32, #tpu.memory_space<vmem>>, vector<64x4xf32>
    %cst_37 = arith.constant dense<0.000000e+00> : vector<1x4xf32>
    %81 = tpu.matmul %79, %80, %cst_37 {dimension_numbers = #tpu.dot_dimension_numbers<[1], [0], [0], [1], [0, 0, 1, 1], [], []>} : vector<1x64xf32>, vector<64x4xf32>, vector<1x4xf32> -> vector<1x4xf32>
    %c0_38 = arith.constant 0 : index
    %c0_39 = arith.constant 0 : index
    %82 = vector.load %arg12[%c0_38, %c0_39] : memref<1x4xf32, #tpu.memory_space<vmem>>, vector<1x4xf32>
    %83 = arith.addf %81, %82 : vector<1x4xf32>
    %cst_40 = arith.constant dense<0xFF800000> : vector<1xf32>
    %84 = vector.multi_reduction <maximumf>, %83, %cst_40 [1] : vector<1x4xf32> to vector<1xf32>
    %85 = vector.shape_cast %84 : vector<1xf32> to vector<1x1xf32>
    %86 = vector.broadcast %85 : vector<1x1xf32> to vector<1x4xf32>
    %87 = arith.subf %83, %86 : vector<1x4xf32>
    %88 = math.exp %87 : vector<1x4xf32>
    %cst_41 = arith.constant dense<0.000000e+00> : vector<1xf32>
    %89 = vector.multi_reduction <add>, %88, %cst_41 [1] : vector<1x4xf32> to vector<1xf32>
    %90 = vector.shape_cast %89 : vector<1xf32> to vector<1x1xf32>
    %91 = math.log %90 : vector<1x1xf32>
    %92 = vector.broadcast %91 : vector<1x1xf32> to vector<1x4xf32>
    %93 = arith.subf %87, %92 : vector<1x4xf32>
    %c0_42 = arith.constant 0 : index
    %c0_43 = arith.constant 0 : index
    %c0_44 = arith.constant 0 : index
    %94 = vector.load %arg13[%c0_42, %c0_43, %c0_44] : memref<1x1x4xf32, #tpu.memory_space<vmem>>, vector<1x1x4xf32>
    %95 = vector.shape_cast %94 : vector<1x1x4xf32> to vector<1x4xf32>
    %96 = vector.shape_cast %93 : vector<1x4xf32> to vector<1x1x4xf32>
    tpu.vector_store %arg13[%c0_42, %c0_43, %c0_44], %96 {strides = array<i32>} : memref<1x1x4xf32, #tpu.memory_space<vmem>>, vector<1x1x4xf32>,
    return
  }
  func.func @transform_0(%arg0: i32) -> (i32, i32, i32) {
    %c0_i32 = arith.constant 0 : i32
    %c0_i32_0 = arith.constant 0 : i32
    %c0_i32_1 = arith.constant 0 : i32
    return %arg0, %c0_i32, %c0_i32_0 : i32, i32, i32
  }
  func.func @transform_1(%arg0: i32) -> (i32, i32, i32) {
    %c0_i32 = arith.constant 0 : i32
    %c0_i32_0 = arith.constant 0 : i32
    %c0_i32_1 = arith.constant 0 : i32
    return %arg0, %c0_i32, %c0_i32_0 : i32, i32, i32
  }
  func.func @transform_2(%arg0: i32) -> (i32, i32) {
    %c0_i32 = arith.constant 0 : i32
    %c0_i32_0 = arith.constant 0 : i32
    %c0_i32_1 = arith.constant 0 : i32
    return %c0_i32, %c0_i32_0 : i32, i32
  }
  func.func @transform_3(%arg0: i32) -> (i32, i32) {
    %c0_i32 = arith.constant 0 : i32
    %c0_i32_0 = arith.constant 0 : i32
    %c0_i32_1 = arith.constant 0 : i32
    return %c0_i32, %c0_i32_0 : i32, i32
  }
  func.func @transform_4(%arg0: i32) -> (i32, i32) {
    %c0_i32 = arith.constant 0 : i32
    %c0_i32_0 = arith.constant 0 : i32
    %c0_i32_1 = arith.constant 0 : i32
    return %c0_i32, %c0_i32_0 : i32, i32
  }
  func.func @transform_5(%arg0: i32) -> (i32, i32) {
    %c0_i32 = arith.constant 0 : i32
    %c0_i32_0 = arith.constant 0 : i32
    %c0_i32_1 = arith.constant 0 : i32
    return %c0_i32, %c0_i32_0 : i32, i32
  }
  func.func @transform_6(%arg0: i32) -> (i32, i32) {
    %c0_i32 = arith.constant 0 : i32
    %c0_i32_0 = arith.constant 0 : i32
    %c0_i32_1 = arith.constant 0 : i32
    return %c0_i32, %c0_i32_0 : i32, i32
  }
  func.func @transform_7(%arg0: i32) -> (i32, i32) {
    %c0_i32 = arith.constant 0 : i32
    %c0_i32_0 = arith.constant 0 : i32
    %c0_i32_1 = arith.constant 0 : i32
    return %c0_i32, %c0_i32_0 : i32, i32
  }
  func.func @transform_8(%arg0: i32) -> (i32, i32) {
    %c0_i32 = arith.constant 0 : i32
    %c0_i32_0 = arith.constant 0 : i32
    %c0_i32_1 = arith.constant 0 : i32
    return %c0_i32, %c0_i32_0 : i32, i32
  }
  func.func @transform_9(%arg0: i32) -> (i32, i32) {
    %c0_i32 = arith.constant 0 : i32
    %c0_i32_0 = arith.constant 0 : i32
    %c0_i32_1 = arith.constant 0 : i32
    return %c0_i32, %c0_i32_0 : i32, i32
  }
  func.func @transform_10(%arg0: i32) -> (i32, i32) {
    %c0_i32 = arith.constant 0 : i32
    %c0_i32_0 = arith.constant 0 : i32
    %c0_i32_1 = arith.constant 0 : i32
    return %c0_i32, %c0_i32_0 : i32, i32
  }
  func.func @transform_11(%arg0: i32) -> (i32, i32) {
    %c0_i32 = arith.constant 0 : i32
    %c0_i32_0 = arith.constant 0 : i32
    %c0_i32_1 = arith.constant 0 : i32
    return %c0_i32, %c0_i32_0 : i32, i32
  }
  func.func @transform_12(%arg0: i32) -> (i32, i32, i32) {
    %c0_i32 = arith.constant 0 : i32
    %c0_i32_0 = arith.constant 0 : i32
    %c0_i32_1 = arith.constant 0 : i32
    return %arg0, %c0_i32, %c0_i32_0 : i32, i32, i32
  }
}

</mosaic_0001>

<bundles_post_ra>
// kernel: tpu_custom_call.1
= control target key start
LH: loop header
LB: loop body
LE: loop exit
PB: predicated region body
PF: predicated region fallthrough
CT: control target
= control target key end

     0   :  { %s2250_s0 = inlined_call_operand.hbm [shape: f32[2,16,16], index: 0, kind: input, shape index: {}]   ;;  %s2251_s1 = inlined_call_operand.hbm [shape: f32[2,16,16], index: 1, kind: input, shape index: {}]   ;;  %s2252_s2 = inlined_call_operand.hbm [shape: f32[16,128], index: 2, kind: input, shape index: {}]   ;;  %s2253_s3 = inlined_call_operand.vmem [shape: f32[1,128], index: 3, kind: input, shape index: {}]   ;;  %s2254_s4 = inlined_call_operand.vmem [shape: f32[128,128], index: 4, kind: input, shape index: {}]   ;;  %s2255_s5 = inlined_call_operand.vmem [shape: f32[1,128], index: 5, kind: input, shape index: {}]   ;;  %s2256_s6 = inlined_call_operand.vmem [shape: f32[128,128], index: 6, kind: input, shape index: {}]   ;;  %s2257_s7 = inlined_call_operand.vmem [shape: f32[1,128], index: 7, kind: input, shape index: {}]   ;;  %s2258_s8 = inlined_call_operand.vmem [shape: f32[128,64], index: 8, kind: input, shape index: {}]   ;;  %s2259_s9 = inlined_call_operand.vmem [shape: f32[1,64], index: 9, kind: input, shape index: {}]   ;;  %s2260_s10 = inlined_call_operand.vmem [shape: f32[64,4], index: 10, kind: input, shape index: {}]   ;;  %s2261_s11 = inlined_call_operand.vmem [shape: f32[1,4], index: 11, kind: input, shape index: {}]   ;;  %s2262_s12 = inlined_call_operand.hbm [shape: f32[2,1,4], index: 12, kind: output, shape index: {}]  }
   0x1   :  { %2278 = sst [smem:[#allocation19_spill]] %s2250_s0 }
   0x2   :  { %2279 = sst [smem:[#allocation20_spill]] %s2252_s2 }
   0x3   :  { %2280 = sst [smem:[#allocation21_spill]] %s2259_s9 }
   0x4   :  { %2281 = sst [smem:[#allocation22_spill]] %s2261_s11 }
   0x5   :  { %2282 = sst [smem:[#allocation23_spill]] %s2262_s12 }
   0x6   :  { %17 = vsyncpa [#allocation3], 0 }
   0x7   :  { %19 = vsyncpa [#allocation3 + $0x1], 0 }
   0x8   :  { %20 = vsyncpa [#allocation6], 0 }
   0x9   :  { %22 = vsyncpa [#allocation6 + $0x1], 0 }
   0xa   :  { %23 = vsyncpa [#allocation4], 0 }
   0xb   :  { %25 = vsyncpa [#allocation4 + $0x1], 0  ;;  %s1719_s21 = smov 0   ;;  %s1721_s22 = smov 0  }
   0xc   :  { %s1723_s23 = smov 0   ;;  %s1725_s24 = smov 0  }
   0xd LB: > { %2283 = sst [smem:[#allocation13_spill]] %s1631_s21  ;;  %s1740_s25 = sadd.s32 4294967295, %s1643_s24   ;;  %s1643_s24 = sphi %s1725_s24, %s2312_s24   ;;  %s1639_s23 = sphi %s1723_s23, %s2314_s23   ;;  %s1635_s22 = sphi %s1721_s22, %s2316_s22   ;;  %s1631_s21 = sphi %s1719_s21, %s2315_s21  }
   0xe   : > { %2284 = sst [smem:[#allocation14_spill]] %s1639_s23  ;;  %s1173_s26 = sadd.s32 4294967294, %s1643_s24  }
   0xf   : > { %p51_p0 = scmp.ne.s32.totalorder %s1635_s22, %s1631_s21  ;;  %p2267_p1 = scmp.eq.s32.totalorder %s1740_s25, 0 }
  0x10   : > { %p317_p3 = scmp.eq.s32.totalorder %s1173_s26, 1  ;;  %p1174_p5 = scmp.ge.s32.totalorder %s1643_s24, 1 }
  0x11   : > { %p1749_p4 = por %p2267_p1, %p51_p0  ;;  %p324_p7 = scmp.lt.s32.totalorder %s1643_s24, 3 }
  0x12   : > { %p1754_p6 = por %p317_p3, %p51_p0  ;;  %s1645_s30 = smov [#allocation7]  }
  0x13   : > { %s2285_s27 = scalar_select %p1749_p4, 1, 0 }
  0x14   : > { %s2286_s28 = scalar_select %p1754_p6, 1, 0 }
  0x15   : > { %p1759_p8 = pnand %p1174_p5, %p324_p7  ;;  %s336_s13 = sshll.u32 %s1645_s30, 4  ;;  %s1763_s13 = int_to_ptr.vmem [resolvable:$true] %s336_s13 }
  0x16   : > { %2287 = sst [smem:[#allocation15_spill]] %s2286_s28  ;;  %s1775_s15 = sadd.s32 1, %s1643_s24  }
  0x17   : > { %s2288_s29 = scalar_select %p1759_p8, 1, 0 }
  0x18   : > { %p1416_p9 = pneg %p1759_p8  ;;  %2290 = sst [smem:[#allocation16_spill]] %s1775_s15 }
  0x19   : > { %s38_s16 = sadd.s32 1, %s1639_s23  ;;  %s35_s17 = ssub.s32 %s1643_s24, %s1775_s15 }
  0x1a   : > { %p1770_p11 = pnand %p1416_p9, %p2267_p1  ;;  %s2291_s2 = sld [smem:[#allocation20_spill]] }
  0x1c   : > { %p1483_p13 = pneg %p1770_p11 }
  0x20   : > { %s1481_s20 = scalar_lea.hbm %s2291_s2, 256 }
  0x21   : > { %p1482_p12 = scmp.ne.s32.totalorder %s2291_s2, %s1481_s20  ;;  %p1488_p5 = scmp.lt.u32.totalorder %s1481_s20, %s2291_s2 }
  0x23   : > { %p1484_p0 = pnand %p1483_p13, %p1482_p12 }
  0x25   : > { %p1485_p3 = pneg %p1484_p0 }
  0x27   : > { %p1490_p7 = pnand %p1488_p5, %p1485_p3 }
  0x29   : > { %1493 = shalt.err (!%p1490_p7)
}
  0x2a   : > { %s1494_s15 = scalar_lea.vmem %s1763_s13, 256  ;;  %p1502_p2 = scmp.lt.s32.totalorder %s1763_s13, %s1763_s13 }
  0x2b   : > { %p1495_p9 = scmp.ne.s32.totalorder %s1763_s13, %s1494_s15  ;;  %p1503_p6 = scmp.lt.s32.totalorder %s1494_s15, %s1494_s15 }
  0x2d   : > { %p1497_p10 = pnand %p1495_p9, %p1483_p13  ;;  %p1504_p4 = por %p1503_p6, %p1502_p2 }
  0x2f   : > { %p1498_p1 = pneg %p1497_p10 }
  0x31   : > { %p1505_p8 = pnand %p1504_p4, %p1498_p1 }
  0x33   : > { %1508 = shalt.err (!%p1505_p8)
}
  0x34   : > { %s2271_s18 = smov 128   ;;  %s2273_s21 = smov 8  }
  0x35   : > { %1419 = dma.hbm_to_vmem [thread:$0]  (!%p1770_p11), %s2291_s2, 256, %s1763_s13, [#allocation6], %s2271_s18, %s2271_s18, %s2273_s21  }
  0x36   : > { %p36_p1 = scmp.eq.s32.totalorder %s35_s17, 0  ;;  %p45_p2 = scmp.ne.s32.totalorder %s1639_s23, %s1635_s22 }
  0x37   : > { %p46_p4 = scmp.eq.s32.totalorder %s1643_s24, 0  ;;  %p1432_p6 = scmp.lt.s32.totalorder %s1643_s24, 2 }
  0x38   : > { %s1809_s19 = scalar_select %p36_p1, %s1639_s23, %s38_s16  }
  0x39   : > { %p47_p8 = por %p46_p4, %p45_p2  ;;  %p2293_p10 = scmp.eq.s32.totalorder %s1740_s25, 1 }
  0x3a   : > { %2292 = sst [smem:[#allocation17_spill]] %s1809_s19  ;;  %s377_s14 = sand.u32 1, %s1639_s23  }
  0x3b   : > { %p1813_p12 = por %p2293_p10, %p45_p2  ;;  %s1198_s26 = sshll.u32 %s1643_s24, 8 }
  0x3c   : > { %s1819_s30 = sshll.u32 %s377_s14, 4  ;;  %s2296_s0 = sld [smem:[#allocation19_spill]] }
  0x3d   : > { %s2294_s20 = scalar_select %p1813_p12, 1, 0 }
  0x3e   : > { %s381_s16 = scalar_lea.vmem [#allocation2], %s1819_s30  ;;  %p1827_p11 = pnand %p1432_p6, %p47_p8 }
  0x3f   : > { %2295 = sst [smem:[#allocation18_spill]] %s2294_s20  ;;  %s388_s17 = sshll.u32 %s381_s16, 4  ;;  %s1831_s17 = int_to_ptr.vmem [resolvable:$true] %s388_s17 }
  0x40   : > { %s1836_s11 = scalar_lea.hbm %s2251_s1, %s1198_s26  ;;  %s1838_s12 = scalar_lea.sflag [#allocation3], %s377_s14 }
  0x41   : > { %p1511_p0 = pneg %p1827_p11 }
  0x42   : > { %s1824_s13 = scalar_lea.hbm %s2296_s0, %s1198_s26  ;;  %s1514_s19 = scalar_lea.hbm %s2296_s0, 512 }
  0x43   : > { %s1509_s21 = scalar_lea.hbm %s1824_s13, 256  ;;  %p1515_p7 = scmp.lt.u32.totalorder %s1824_s13, %s2296_s0 }
  0x44   : > { %p1510_p13 = scmp.ne.s32.totalorder %s1824_s13, %s1509_s21  ;;  %p1516_p9 = scmp.lt.u32.totalorder %s1514_s19, %s1509_s21 }
  0x45   : > { %p1518_p2 = scmp.lt.u32.totalorder %s1509_s21, %s1824_s13 }
  0x46   : > { %p1512_p3 = pnand %p1511_p0, %p1510_p13  ;;  %p1517_p1 = por %p1516_p9, %p1515_p7 }
  0x48   : > { %p1513_p5 = pneg %p1512_p3  ;;  %p1519_p4 = por %p1518_p2, %p1517_p1 }
  0x4a   : > { %p1520_p6 = pnand %p1519_p4, %p1513_p5 }
  0x4c   : > { %1523 = shalt.err (!%p1520_p6)
}
  0x4d   : > { %s1524_s18 = scalar_lea.vmem %s1831_s17, 256  ;;  %s1648_s2 = smov [#allocation2]  }
  0x4e   : > { %p1525_p8 = scmp.ne.s32.totalorder %s1831_s17, %s1524_s18  ;;  %s1529_s14 = sshll.u32 %s1648_s2, 4  ;;  %s1530_s14 = int_to_ptr.vmem [resolvable:$false] %s1529_s14 }
  0x4f   : > { %s1531_s23 = scalar_lea.vmem %s1530_s14, 512  ;;  %p1532_p3 = scmp.lt.s32.totalorder %s1831_s17, %s1530_s14 }
  0x50   : > { %p1527_p10 = pnand %p1525_p8, %p1511_p0  ;;  %p1533_p7 = scmp.lt.s32.totalorder %s1531_s23, %s1524_s18 }
  0x52   : > { %p1528_p13 = pneg %p1527_p10  ;;  %p1534_p9 = por %p1533_p7, %p1532_p3 }
  0x54   : > { %p1535_p1 = pnand %p1534_p9, %p1528_p13 }
  0x56   : > { %1538 = shalt.err (!%p1535_p1)
}
  0x57   : > { %s2298_s21 = smov 8   ;;  %s2299_s19 = smov 128  }
  0x58   : > { %1423 = dma.hbm_to_vmem [thread:$0]  (!%p1827_p11), %s1824_s13, 256, %s1831_s17, %s1838_s12, %s2299_s19, %s2299_s19, %s2298_s21  }
  0x59   : > { %s402_s20 = scalar_lea.vmem [#allocation5], %s1819_s30  ;;  %s398_s15 = sand.u32 1, %s1643_s24  }
  0x5a   : > { %s409_s26 = sshll.u32 %s402_s20, 4  ;;  %s1873_s16 = scalar_lea.sflag [#allocation6], %s398_s15  ;;  %s1871_s26 = int_to_ptr.vmem [resolvable:$true] %s409_s26 }
  0x5b   : > { %s1539_s18 = scalar_lea.hbm %s1836_s11, 256  ;;  %s1544_s23 = scalar_lea.hbm %s2251_s1, 512 }
  0x5c   : > { %p1540_p5 = scmp.ne.s32.totalorder %s1836_s11, %s1539_s18  ;;  %p1545_p6 = scmp.lt.u32.totalorder %s1836_s11, %s2251_s1 }
  0x5d   : > { %p1546_p8 = scmp.lt.u32.totalorder %s1544_s23, %s1539_s18  ;;  %p1548_p13 = scmp.lt.u32.totalorder %s1539_s18, %s1836_s11 }
  0x5e   : > { %p1542_p2 = pnand %p1540_p5, %p1511_p0 }
  0x5f   : > { %p1547_p10 = por %p1546_p8, %p1545_p6 }
  0x60   : > { %p1543_p4 = pneg %p1542_p2 }
  0x61   : > { %p1549_p3 = por %p1548_p13, %p1547_p10 }
  0x63   : > { %p1550_p7 = pnand %p1549_p3, %p1543_p4 }
  0x65   : > { %1553 = shalt.err (!%p1550_p7)
}
  0x66   : > { %s1554_s30 = scalar_lea.vmem %s1871_s26, 256  ;;  %s1649_s13 = smov [#allocation5]  }
  0x67   : > { %p1555_p9 = scmp.ne.s32.totalorder %s1871_s26, %s1554_s30  ;;  %s1559_s17 = sshll.u32 %s1649_s13, 4  ;;  %s1560_s17 = int_to_ptr.vmem [resolvable:$false] %s1559_s17 }
  0x68   : > { %s1561_s0 = scalar_lea.vmem %s1560_s17, 512  ;;  %p1562_p2 = scmp.lt.s32.totalorder %s1871_s26, %s1560_s17 }
  0x69   : > { %p1557_p1 = pnand %p1555_p9, %p1511_p0  ;;  %p1563_p6 = scmp.lt.s32.totalorder %s1561_s0, %s1554_s30 }
  0x6b   : > { %p1558_p5 = pneg %p1557_p1  ;;  %p1564_p8 = por %p1563_p6, %p1562_p2 }
  0x6d   : > { %p1565_p10 = pnand %p1564_p8, %p1558_p5 }
  0x6f   : > { %1568 = shalt.err (!%p1565_p10)
}
  0x70   : > { %1426 = dma.hbm_to_vmem [thread:$0]  (!%p1827_p11), %s1836_s11, 256, %s1871_s26, %s1873_s16, %s2299_s19, %s2299_s19, %s2298_s21  }
  0x71   : > { %p2300_p0 = scmp.ne.s32.totalorder %s2288_s29, 0 }
  0x72   : > { %s1905_s9 = sand.u32 (!%p2300_p0), 1, %s1635_s22   ;;  %p2301_p4 = scmp.ne.s32.totalorder (!%p2300_p0), %s2285_s27, 0 }
  0x73   : > { %421 = sbr.rel (%p2300_p0) target bundleno = 2401 (0x961), region = 68  ;;  %s1184_s12 = sshll.u32 (!%p2300_p0), %s1905_s9, 4 }
  0x74   : > { %s424_s20 = scalar_lea.sflag (!%p2300_p0), [#allocation3], %s1905_s9  ;;  %s427_s15 = scalar_lea.vmem (!%p2300_p0), [#allocation2], %s1184_s12 }
  0x7a   : > { %1614 = dma.done.wait (%p2301_p4), %s424_s20, 256  }
  0x7b   : > { %1616 = vsyncadd (%p2301_p4), %s424_s20, 4294967040  ;;  %s432_s28 = sand.u32 1, %s1740_s25   ;;  %s436_s29 = scalar_lea.vmem [#allocation5], %s1184_s12 }
  0x7c   : > { %s433_s11 = scalar_lea.sflag [#allocation6], %s432_s28 }
  0x7d   : > { %1618 = dma.done.wait (%p2301_p4), %s433_s11, 256  }
  0x7e   : > { %1620 = vsyncadd (%p2301_p4), %s433_s11, 4294967040  ;;  %p2302_p11 = scmp.eq.s32.totalorder %s1740_s25, 0 }
  0x80   : > { %1622 = dma.done.wait (%p2302_p11), [#allocation6], 256   ;;  %p2303_p13 = pmov %p2302_p11 }
  0x81   : > { %vm488_vm0 = vcmask 130048   ;;  %v486_v0 = vld [vmem:[%s427_s15] sm:$0xff]  ;;  %v487_v1 = vld [vmem:[%s427_s15 + $0x8] sm:$0xff]  ;;  %v1650_v5 = vmov 0.0   ;;  %vm1651_vm1 = vmmov 0   ;;  %s2304_s2 = sld [smem:[#allocation21_spill]] }
  0x82   : > { %1624 = vsyncadd (%p2303_p13), [#allocation6], 4294967040  ;;  %v489_v2 = vsel %vm488_vm0, %v486_v0, 0.0  ;;  %v1923_v3 = vpack.c.bf16 %v487_v1, %v486_v0  ;;  %v492_v4 = vsel %vm488_vm0, %v487_v1, 0.0  ;;  %1252 = vmatprep.subr.bf16.mxu0 %v1650_v5  ;;  %1258 = vmatprep.subr.bf16.mxu1 %v1650_v5  ;;  %v502_v11 = vld [vmem:[%s436_s29] sm:$0xff]  ;;  %v503_v12 = vld [vmem:[%s436_s29 + $0x8] sm:$0xff] }
  0x83   : > { %490 = vadd.xlane.f32.xlu0 %v489_v2  ;;  %1254 = vmatprep.mubr.msk.bf16.mxu0 %vm1651_vm1, %v1650_v5  ;;  %v558_v17 = vld [vmem:[#allocation7] sm:$0xff]  ;;  %v559_v18 = vld [vmem:[#allocation7 + $0x8] sm:$0xff]  ;;  %v617_v22 = vld [vmem:[%s2254_s4 + $0x10] sm:$0xff]  ;;  %vm974_vm2 = vcmask 523264   ;;  %s2305_s30 = sld [smem:[#allocation22_spill]]  ;;  %vm1048_vm3 = vcmask 24576  }
  0x84   : > { %1260 = vmatprep.mubr.msk.bf16.mxu1 %vm1651_vm1, %v1650_v5  ;;  %v560_v19 = vpack.c.bf16 %v559_v18, %v558_v17  ;;  %v615_v20 = vld [vmem:[%s2254_s4] sm:$0xff]  ;;  %v616_v21 = vld [vmem:[%s2254_s4 + $0x8] sm:$0xff]  ;;  %v618_v24 = vld [vmem:[%s2254_s4 + $0x18] sm:$0xff]  ;;  %s1195_s17 = sshll.u32 %s1740_s25, 4  ;;  %s484_s0 = scalar_lea.vmem [#allocation8], %s1905_s9 }
  0x85   : > { %v631_v23 = vpack.c.bf16 %v616_v21, %v615_v20  ;;  %v632_v25 = vpack.c.bf16 %v618_v24, %v617_v22  ;;  %v619_v26 = vld [vmem:[%s2254_s4 + $0x20] sm:$0xff]  ;;  %v620_v27 = vld [vmem:[%s2254_s4 + $0x28] sm:$0xff]  ;;  %v621_v29 = vld [vmem:[%s2254_s4 + $0x30] sm:$0xff]  ;;  %s1075_s12 = sshll.u32 %s484_s0, 4  ;;  %s2307_s28 = sld [smem:[#allocation23_spill]]  ;;  %s2207_s12 = int_to_ptr.vmem [resolvable:$true] %s1075_s12 }
  0x86   : > { %1259 = vmatpush3.bf16.msra.mxu1 %v560_v19  ;;  %v633_v28 = vpack.c.bf16 %v620_v27, %v619_v26  ;;  %v622_v30 = vld [vmem:[%s2254_s4 + $0x38] sm:$0xff]  ;;  %v623_v32 = vld [vmem:[%s2254_s4 + $0x40] sm:$0xff]  ;;  %v624_v33 = vld [vmem:[%s2254_s4 + $0x48] sm:$0xff]  ;;  %s1063_s29 = scalar_lea.sflag [#allocation4], %s1905_s9  ;;  %s1569_s27 = scalar_lea.vmem %s2207_s12, 16 }
  0x87   : > { %493 = vadd.xlane.f32.xlu0 %v492_v4  ;;  %1284 = vmatprep.subr.bf16.mxu1 %v1650_v5  ;;  %v634_v31 = vpack.c.bf16 %v622_v30, %v621_v29  ;;  %v635_v34 = vpack.c.bf16 %v624_v33, %v623_v32  ;;  %v625_v35 = vld [vmem:[%s2254_s4 + $0x50] sm:$0xff]  ;;  %v626_v36 = vld [vmem:[%s2254_s4 + $0x58] sm:$0xff]  ;;  %v627_v51 = vld [vmem:[%s2254_s4 + $0x60] sm:$0xff]  ;;  %p1570_p3 = scmp.ne.s32.totalorder %s2207_s12, %s1569_s27  ;;  %s1653_s25 = smov [#allocation8]  }
  0x88   : > { %v636_v37 = vpack.c.bf16 %v626_v36, %v625_v35  ;;  %v628_v52 = vld [vmem:[%s2254_s4 + $0x68] sm:$0xff]  ;;  %v629_v54 = vld [vmem:[%s2254_s4 + $0x70] sm:$0xff]  ;;  %v630_v55 = vld [vmem:[%s2254_s4 + $0x78] sm:$0xff]  ;;  %s1573_s21 = sshll.u32 %s1653_s25, 4  ;;  %s1574_s21 = int_to_ptr.vmem [resolvable:$false] %s1573_s21 }
  0x89   : > { %v637_v53 = vpack.c.bf16 %v628_v52, %v627_v51  ;;  %v638_v56 = vpack.c.bf16 %v630_v55, %v629_v54  ;;  %v1188_v57 = vld [vmem:[%s2253_s3] ss:$0 sm:$0xff]  ;;  %v744_v17 = vld [vmem:[%s2256_s6 + $0x10] sm:$0xff]  ;;  %v745_v18 = vld [vmem:[%s2256_s6 + $0x18] sm:$0xff]  ;;  %p1571_p7 = pnand %p1570_p3, %p1813_p12  ;;  %s1575_s19 = scalar_lea.vmem %s1574_s21, 32 }
  0x8a   : > { %v759_v19 = vpack.c.bf16 %v745_v18, %v744_v17  ;;  %v746_v20 = vld [vmem:[%s2256_s6 + $0x20] sm:$0xff]  ;;  %v747_v21 = vld [vmem:[%s2256_s6 + $0x28] sm:$0xff]  ;;  %v749_v24 = vld [vmem:[%s2256_s6 + $0x38] sm:$0xff]  ;;  %p1576_p1 = scmp.lt.s32.totalorder %s2207_s12, %s1574_s21  ;;  %p1577_p5 = scmp.lt.s32.totalorder %s1575_s19, %s1569_s27 }
  0x8b   : > { %v760_v22 = vpack.c.bf16 %v747_v21, %v746_v20  ;;  %v750_v26 = vld [vmem:[%s2256_s6 + $0x40] sm:$0xff]  ;;  %v751_v27 = vld [vmem:[%s2256_s6 + $0x48] sm:$0xff]  ;;  %v752_v29 = vld [vmem:[%s2256_s6 + $0x50] sm:$0xff]  ;;  %s2205_s11 = scalar_lea.hbm %s2307_s28, %s1195_s17  ;;  %p1572_p9 = pneg %p1571_p7 }
  0x8c   : > { %v753_v30 = vld [vmem:[%s2256_s6 + $0x58] sm:$0xff]  ;;  %v754_v32 = vld [vmem:[%s2256_s6 + $0x60] sm:$0xff]  ;;  %v755_v33 = vld [vmem:[%s2256_s6 + $0x68] sm:$0xff]  ;;  %p1578_p2 = por %p1577_p5, %p1576_p1 }
  0x8d   : > { %v756_v35 = vld [vmem:[%s2256_s6 + $0x70] sm:$0xff]  ;;  %v757_v36 = vld [vmem:[%s2256_s6 + $0x78] sm:$0xff]  ;;  %v889_v20 = vld [vmem:[%s2258_s8 + $0x60] sm:$0xff] }
  0x8e   : > { %v887_v17 = vld [vmem:[%s2258_s8 + $0x50] sm:$0xff]  ;;  %v888_v18 = vld [vmem:[%s2258_s8 + $0x58] sm:$0xff]  ;;  %v890_v21 = vld [vmem:[%s2258_s8 + $0x68] sm:$0xff]  ;;  %p1579_p6 = pnand %p1578_p2, %p1572_p9 }
 0x110   : > { %v491_v6 = vpop.xlane.xlu0 %490 }
 0x111   : > { %v495_v7 = vadd.f32 1.0, %v491_v6 }
 0x113   : > { %1473 = vrsqrt.f32 %v495_v7 }
 0x114   : > { %v494_v8 = vpop.xlane.xlu0 %493 }
 0x115   : > { %v496_v9 = vadd.f32 1.0, %v494_v8 }
 0x117   : > { %1475 = vrsqrt.f32 %v496_v9 }
 0x11d   : > { %v1932_v10 = vpop.eup %1473 }
 0x11e   : > { %v504_v14 = vmul.f32 %v1932_v10, %v502_v11  ;;  %v1988_v38 = vmul.f32 %v1932_v10, %v1932_v10 }
 0x120   : > { %v553_v42 = vmul.f32 %v502_v11, %v1988_v38 }
 0x121   : > { %v1934_v13 = vpop.eup %1475 }
 0x122   : > { %v505_v15 = vmul.f32 %v1934_v13, %v503_v12  ;;  %v1992_v39 = vmul.f32 %v1934_v13, %v1934_v13 }
 0x124   : > { %v506_v16 = vpack.c.bf16 %v505_v15, %v504_v14  ;;  %v554_v47 = vmul.f32 %v503_v12, %v1992_v39  ;;  %v742_v12 = vld [vmem:[%s2256_s6] sm:$0xff]  ;;  %v743_v14 = vld [vmem:[%s2256_s6 + $0x8] sm:$0xff] }
 0x126   : > { %1253 = vmatpush3.bf16.msra.mxu0 %v506_v16  ;;  %v758_v16 = vpack.c.bf16 %v743_v14, %v742_v12  ;;  %v885_v14 = vld [vmem:[%s2258_s8 + $0x40] sm:$0xff] }
 0x127   : > { %1264 = vmatprep.subr.bf16.mxu0 %v1650_v5 }
 0x129   : > { %1255 = vmatmul.mubr.msk.bf16.vlgmr.msra.gmra.mrb[0].mxu0 %vm488_vm0, %v1923_v3 }
 0x12a   : > { %1280 = vmatprep.mubr.msk.bf16.mxu0 %vm1651_vm1, %v1650_v5  ;;  %1265 = vmatpush3.bf16.msra.mxu0 %v631_v23  ;;  %v748_v23 = vld [vmem:[%s2256_s6 + $0x30] sm:$0xff] }
 0x12b   : > { %1266 = vmatprep.subr.bf16.mxu0 %v1650_v5 }
 0x12e   : > { %1267 = vmatpush3.bf16.msra.mxu0 %v632_v25  ;;  %v761_v25 = vpack.c.bf16 %v749_v24, %v748_v23  ;;  %v1389_v23 = vpack.c.bf16 %v890_v21, %v889_v20  ;;  %v892_v24 = vld [vmem:[%s2258_s8 + $0x78] sm:$0xff] }
 0x12f   : > { %1268 = vmatprep.subr.bf16.mxu0 %v1650_v5 }
 0x132   : > { %1269 = vmatpush3.bf16.msra.mxu0 %v633_v28  ;;  %v762_v28 = vpack.c.bf16 %v751_v27, %v750_v26  ;;  %v965_v26 = vld [vmem:[%s2260_s10] sm:$0xff]  ;;  %v966_v27 = vld [vmem:[%s2260_s10 + $0x8] sm:$0xff] }
 0x133   : > { %1270 = vmatprep.subr.bf16.mxu0 %v1650_v5 }
 0x136   : > { %1271 = vmatpush3.bf16.msra.mxu0 %v634_v31  ;;  %v763_v31 = vpack.c.bf16 %v753_v30, %v752_v29  ;;  %v1395_v29 = vpack.c.bf16 %v966_v27, %v965_v26  ;;  %v968_v30 = vld [vmem:[%s2260_s10 + $0x18] sm:$0xff] }
 0x137   : > { %1272 = vmatprep.subr.bf16.mxu0 %v1650_v5 }
 0x13a   : > { %1273 = vmatpush3.bf16.msra.mxu0 %v635_v34  ;;  %v764_v34 = vpack.c.bf16 %v755_v33, %v754_v32  ;;  %v969_v32 = vld [vmem:[%s2260_s10 + $0x20] sm:$0xff]  ;;  %v970_v33 = vld [vmem:[%s2260_s10 + $0x28] sm:$0xff] }
 0x13b   : > { %1274 = vmatprep.subr.bf16.mxu0 %v1650_v5 }
 0x13e   : > { %1275 = vmatpush3.bf16.msra.mxu0 %v636_v37  ;;  %v765_v37 = vpack.c.bf16 %v757_v36, %v756_v35 }
 0x13f   : > { %1276 = vmatprep.subr.bf16.mxu0 %v1650_v5 }
 0x142   : > { %1277 = vmatpush3.bf16.msra.mxu0 %v637_v53 }
 0x143   : > { %1278 = vmatprep.subr.bf16.mxu0 %v1650_v5 }
 0x146   : > { %1279 = vmatpush3.bf16.msra.mxu0 %v638_v56  ;;  %v877_v56 = vld [vmem:[%s2258_s8] sm:$0xff] }
 0x1fc   : > { %v544_v40 = vpop.f32.mrb[0].mxu0 }
 0x1fd   : > { %v551_v41 = vmul.f32 %v1932_v10, %v544_v40  ;;  %v1256_v43 = vpop.f32.mrb[1].mxu0 }
 0x1fe   : > { %v547_v44 = vpop.f32.mrb[2].mxu0 }
 0x1ff   : > { %v555_v45 = vadd.f32 %v553_v42, %v551_v41  ;;  %v552_v46 = vmul.f32 %v1934_v13, %v547_v44  ;;  %v1257_v48 = vpop.f32.mrb[3].mxu0  ;;  %v1191_v44 = vld [vmem:[%s2255_s5] ss:$0 sm:$0xff] }
 0x201   : > { %v556_v49 = vadd.f32 %v554_v47, %v552_v46 }
 0x203   : > { %v557_v50 = vpack.c.bf16 %v556_v49, %v555_v45 }
 0x205   : > { %1261 = vmatmul.mubr.msk.bf16.vlgmr.msra.gmra.mrb[0].mxu1 %vm488_vm0, %v557_v50 }
 0x206   : > { %1286 = vmatprep.mubr.msk.bf16.mxu1 %vm1651_vm1, %v1650_v5 }
 0x2d8   : > { %v605_v58 = vpop.f32.mrb[0].mxu1 }
 0x2d9   : > { %v606_v59 = vadd.f32 %v1188_v57, %v605_v58  ;;  %v1262_v60 = vpop.f32.mrb[1].mxu1  ;;  %v1652_v58 = vmov 0.0|0.0  }
 0x2da   : > { %v608_v61 = vpop.f32.mrb[2].mxu1  ;;  %1370 = vmatprep.subr.bf16.mxu0 %v1652_v58 }
 0x2db   : > { %v609_v62 = vadd.f32 %v1188_v57, %v608_v61  ;;  %v1263_v63 = vpop.f32.mrb[3].mxu1  ;;  %v612_v0 = vmax.f32 %v606_v59, 0.0  ;;  %v878_v57 = vld [vmem:[%s2258_s8 + $0x8] sm:$0xff] }
 0x2dc   : > { %v1371_v59 = vpack.c.bf16 %v878_v57, %v877_v56 }
 0x2dd   : > { %v613_v1 = vmax.f32 %v609_v62, 0.0 }
 0x2df   : > { %v614_v2 = vpack.c.bf16 %v613_v1, %v612_v0 }
 0x2e1   : > { %1281 = vmatmul.mubr.bf16.vlgmr.msra.gmra.mrb[4].mxu0 %v614_v2 }
 0x2e2   : > { %1348 = vmatprep.mubr.msk.f32.mxu0 %vm1651_vm1, %v1650_v5  ;;  %1372 = vmatpush3.bf16.msra.mxu0 %v1371_v59  ;;  %v893_v59 = vld [vmem:[%s2304_s2] sm:$0x1] }
 0x2e3   : > { %1373 = vmatprep.subr.bf16.mxu0 %v1652_v58 }
 0x3b4   : > { %v673_v4 = vpop.f32.mrb[4].mxu0 }
 0x3b5   : > { %v1282_v6 = vpop.f32.mrb[5].mxu0  ;;  %v680_v8 = vmul.f32 %v1932_v10, %v673_v4  ;;  %v726_v41 = vmul.f32 %v673_v4, %v1988_v38  ;;  %v879_v4 = vld [vmem:[%s2258_s8 + $0x10] sm:$0xff] }
 0x3b6   : > { %v676_v7 = vpop.f32.mrb[6].mxu0  ;;  %v880_v6 = vld [vmem:[%s2258_s8 + $0x18] sm:$0xff] }
 0x3b7   : > { %v681_v9 = vmul.f32 %v1934_v13, %v676_v7  ;;  %v1283_v11 = vpop.f32.mrb[7].mxu0  ;;  %v727_v46 = vmul.f32 %v676_v7, %v1992_v39  ;;  %v1374_v7 = vpack.c.bf16 %v880_v6, %v879_v4 }
 0x3b8   : > { %v884_v11 = vld [vmem:[%s2258_s8 + $0x38] sm:$0xff] }
 0x3b9   : > { %v682_v15 = vpack.c.bf16 %v681_v9, %v680_v8  ;;  %1375 = vmatpush3.bf16.msra.mxu0 %v1374_v7  ;;  %v881_v8 = vld [vmem:[%s2258_s8 + $0x20] sm:$0xff]  ;;  %v883_v9 = vld [vmem:[%s2258_s8 + $0x30] sm:$0xff] }
 0x3ba   : > { %1376 = vmatprep.subr.bf16.mxu0 %v1652_v58  ;;  %v1380_v12 = vpack.c.bf16 %v884_v11, %v883_v9 }
 0x3bb   : > { %1285 = vmatpush3.bf16.msra.mxu1 %v682_v15  ;;  %v886_v15 = vld [vmem:[%s2258_s8 + $0x48] sm:$0xff] }
 0x3bc   : > { %1290 = vmatprep.subr.bf16.mxu1 %v1650_v5 }
 0x3be   : > { %1287 = vmatmul.mubr.msk.bf16.vlgmr.msra.gmra.mrb[4].mxu1 %vm488_vm0, %v1923_v3 }
 0x3bf   : > { %1291 = vmatpush3.bf16.msra.mxu1 %v758_v16  ;;  %1306 = vmatprep.mubr.msk.bf16.mxu1 %vm1651_vm1, %v1650_v5  ;;  %v1383_v16 = vpack.c.bf16 %v886_v15, %v885_v14 }
 0x3c0   : > { %1292 = vmatprep.subr.bf16.mxu1 %v1650_v5 }
 0x3c3   : > { %1293 = vmatpush3.bf16.msra.mxu1 %v759_v19  ;;  %v1386_v19 = vpack.c.bf16 %v888_v18, %v887_v17 }
 0x3c4   : > { %1294 = vmatprep.subr.bf16.mxu1 %v1650_v5 }
 0x3c7   : > { %1295 = vmatpush3.bf16.msra.mxu1 %v760_v22  ;;  %v891_v22 = vld [vmem:[%s2258_s8 + $0x70] sm:$0xff] }
 0x3c8   : > { %1296 = vmatprep.subr.bf16.mxu1 %v1650_v5 }
 0x3cb   : > { %1297 = vmatpush3.bf16.msra.mxu1 %v761_v25  ;;  %v1392_v25 = vpack.c.bf16 %v892_v24, %v891_v22 }
 0x3cc   : > { %1298 = vmatprep.subr.bf16.mxu1 %v1650_v5 }
 0x3cf   : > { %1299 = vmatpush3.bf16.msra.mxu1 %v762_v28  ;;  %v967_v28 = vld [vmem:[%s2260_s10 + $0x10] sm:$0xff] }
 0x3d0   : > { %1300 = vmatprep.subr.bf16.mxu1 %v1650_v5 }
 0x3d3   : > { %1301 = vmatpush3.bf16.msra.mxu1 %v763_v31  ;;  %v1398_v31 = vpack.c.bf16 %v968_v30, %v967_v28 }
 0x3d4   : > { %1302 = vmatprep.subr.bf16.mxu1 %v1650_v5 }
 0x3d7   : > { %1303 = vmatpush3.bf16.msra.mxu1 %v764_v34  ;;  %v1401_v34 = vpack.c.bf16 %v970_v33, %v969_v32 }
 0x3d8   : > { %1304 = vmatprep.subr.bf16.mxu1 %v1650_v5 }
 0x3db   : > { %1305 = vmatpush3.bf16.msra.mxu1 %v765_v37 }
 0x3dc   : > { %1310 = vmatprep.subr.bf16.mxu1 %v1650_v5 }
 0x491   : > { %v717_v40 = vpop.f32.mrb[4].mxu1 }
 0x492   : > { %v724_v42 = vmul.f32 %v1932_v10, %v717_v40  ;;  %v1288_v43 = vpop.f32.mrb[5].mxu1 }
 0x493   : > { %v720_v45 = vpop.f32.mrb[6].mxu1 }
 0x494   : > { %v728_v47 = vadd.f32 %v726_v41, %v724_v42  ;;  %v725_v48 = vmul.f32 %v1934_v13, %v720_v45  ;;  %v1289_v49 = vpop.f32.mrb[7].mxu1  ;;  %v1193_v41 = vld [vmem:[%s2257_s7] ss:$0 sm:$0xff] }
 0x496   : > { %v737_v50 = vadd.f32 %v1191_v44, %v728_v47  ;;  %v729_v51 = vadd.f32 %v727_v46, %v725_v48 }
 0x498   : > { %v738_v52 = vadd.f32 %v1191_v44, %v729_v51  ;;  %v739_v53 = vmax.f32 %v737_v50, 0.0 }
 0x49a   : > { %v740_v54 = vmax.f32 %v738_v52, 0.0 }
 0x49c   : > { %v741_v55 = vpack.c.bf16 %v740_v54, %v739_v53 }
 0x49e   : > { %1307 = vmatmul.mubr.bf16.vlgmr.msra.gmra.mrb[8].mxu1 %v741_v55 }
 0x49f   : > { %1312 = vmatprep.mubr.msk.bf16.mxu1 %vm1651_vm1, %v1650_v5 }
 0x571   : > { %v800_v60 = vpop.f32.mrb[8].mxu1 }
 0x572   : > { %v1308_v61 = vpop.f32.mrb[9].mxu1  ;;  %v807_v63 = vmul.f32 %v1932_v10, %v800_v60  ;;  %v853_v36 = vmul.f32 %v800_v60, %v1988_v38 }
 0x573   : > { %v2099_v62 = vpop.f32.mrb[10].mxu1 }
 0x574   : > { %v808_v0 = vmul.f32 %v1934_v13, %v2099_v62  ;;  %v1309_v1 = vpop.f32.mrb[11].mxu1  ;;  %v854_v43 = vmul.f32 %v2099_v62, %v1992_v39  ;;  %v971_v39 = vld [vmem:[%s2260_s10 + $0x30] sm:$0xff] }
 0x576   : > { %v809_v2 = vpack.c.bf16 %v808_v0, %v807_v63  ;;  %v973_v0 = vld [vmem:[%s2305_s30] sm:$0x1] }
 0x578   : > { %1311 = vmatpush3.bf16.msra.mxu1 %v809_v2 }
 0x579   : > { %1394 = vmatprep.subr.bf16.mxu1 %v1652_v58 }
 0x57b   : > { %1313 = vmatmul.mubr.msk.bf16.vlgmr.msra.gmra.mrb[12].mxu1 %vm488_vm0, %v1923_v3  ;;  %v882_v3 = vld [vmem:[%s2258_s8 + $0x28] sm:$0xff] }
 0x57c   : > { %1367 = vmatprep.mubr.msk.f32.mxu1 %vm1651_vm1, %v1650_v5  ;;  %v1377_v5 = vpack.c.bf16 %v882_v3, %v881_v8  ;;  %1396 = vmatpush3.bf16.msra.mxu1 %v1395_v29 }
 0x57d   : > { %1397 = vmatprep.subr.bf16.mxu1 %v1652_v58 }
 0x57e   : > { %1378 = vmatpush3.bf16.msra.mxu0 %v1377_v5 }
 0x57f   : > { %1379 = vmatprep.subr.bf16.mxu0 %v1652_v58 }
 0x580   : > { %1399 = vmatpush3.bf16.msra.mxu1 %v1398_v31 }
 0x581   : > { %1400 = vmatprep.subr.bf16.mxu1 %v1652_v58 }
 0x582   : > { %1381 = vmatpush3.bf16.msra.mxu0 %v1380_v12 }
 0x583   : > { %1382 = vmatprep.subr.bf16.mxu0 %v1652_v58 }
 0x584   : > { %1402 = vmatpush3.bf16.msra.mxu1 %v1401_v34 }
 0x585   : > { %1403 = vmatprep.subr.bf16.mxu1 %v1652_v58 }
 0x586   : > { %1384 = vmatpush3.bf16.msra.mxu0 %v1383_v16 }
 0x587   : > { %1385 = vmatprep.subr.bf16.mxu0 %v1652_v58 }
 0x58a   : > { %1387 = vmatpush3.bf16.msra.mxu0 %v1386_v19 }
 0x58b   : > { %1388 = vmatprep.subr.bf16.mxu0 %v1652_v58 }
 0x58e   : > { %1390 = vmatpush3.bf16.msra.mxu0 %v1389_v23 }
 0x58f   : > { %1391 = vmatprep.subr.bf16.mxu0 %v1652_v58 }
 0x592   : > { %1393 = vmatpush3.bf16.msra.mxu0 %v1392_v25 }
 0x64e   : > { %v844_v35 = vpop.f32.mrb[12].mxu1 }
 0x64f   : > { %v851_v37 = vmul.f32 %v1932_v10, %v844_v35  ;;  %v1314_v40 = vpop.f32.mrb[13].mxu1 }
 0x650   : > { %v847_v42 = vpop.f32.mrb[14].mxu1 }
 0x651   : > { %v855_v44 = vadd.f32 %v853_v36, %v851_v37  ;;  %v852_v45 = vmul.f32 %v1934_v13, %v847_v42  ;;  %v1315_v46 = vpop.f32.mrb[15].mxu1  ;;  %v972_v13 = vld [vmem:[%s2260_s10 + $0x38] sm:$0xff] }
 0x652   : > { %v1404_v58 = vpack.c.bf16 %v972_v13, %v971_v39 }
 0x653   : > { %v864_v47 = vadd.f32 %v1193_v41, %v855_v44  ;;  %v856_v48 = vadd.f32 %v854_v43, %v852_v45 }
 0x654   : > { %1405 = vmatpush3.bf16.msra.mxu1 %v1404_v58 }
 0x655   : > { %v865_v49 = vadd.f32 %v1193_v41, %v856_v48  ;;  %v866_v50 = vmax.f32 %v864_v47, 0.0 }
 0x657   : > { %v867_v38 = vmax.f32 %v865_v49, 0.0 }
 0x659   : > { %v868_v51 = vadd.f32 %v867_v38, %v866_v50 }
 0x65b   : > { %v869_v10 = vrot.slane %v868_v51, 4 }
 0x65d   : > { %v870_v52 = vadd.f32 %v869_v10, %v868_v51 }
 0x65f   : > { %v871_v53 = vrot.slane %v870_v52, 2 }
 0x661   : > { %v872_v54 = vadd.f32 %v871_v53, %v870_v52 }
 0x663   : > { %v873_v55 = vrot.slane %v872_v54, 1 }
 0x665   : > { %v874_v56 = vadd.f32 %v873_v55, %v872_v54 }
 0x667   : > { %v876_v57 = vmul.f32 0.0625, %v874_v56 }
 0x669   : > { %1349 = vmatmul.mubr.f32.vlgmr.msra.gmra.mrb[8].mxu0 %v876_v57 }
 0x73c   : > { %v960_v60 = vpop.f32.mrb[8].mxu0 }
 0x73d   : > { %v961_v61 = vadd.f32 %v960_v60, %v893_v59  ;;  %v1350_v62 = vpop.f32.mrb[9].mxu0 }
 0x73f   : > { %v964_v63 = vmax.f32 %v961_v61, 0.0 }
 0x741   : > { %1368 = vmatmul.mubr.msk.f32.vlgmr.msra.gmra.mrb[16].mxu1 %vm974_vm2, %v964_v63 }
 0x814   : > { %v1044_v1 = vpop.f32.mrb[16].mxu1 }
 0x815   : > { %v1045_v2 = vadd.f32 %v1044_v1, %v973_v0  ;;  %v1369_v4 = vpop.f32.mrb[17].mxu1 }
 0x817   : > { %v1049_v6 = vsel %vm1048_vm3, %v1045_v2, -inf }
 0x818   : > { %1050 = vmax.xlane.f32.xlu1 %v1049_v6 }
 0x8a5   : > { %v1051_v7 = vpop.xlane.xlu1 %1050 }
 0x8a6   : > { %v1052_v8 = vsub.f32 %v1045_v2, %v1051_v7 }
 0x8a8   : > { %v1053_v3 = vmul.f32 1.442695, %v1052_v8 }
 0x8aa   : > { %1477 = vpow2.f32 %v1053_v3 }
 0x8b4   : > { %v1478_v5 = vpop.eup %1477 }
 0x8b5   : > { %v1055_v9 = vsel %vm1048_vm3, %v1478_v5, 0.0 }
 0x8b6   : > { %1056 = vadd.xlane.f32.xlu1 %v1055_v9 }
 0x943   : > { %v1057_v11 = vpop.xlane.xlu1 %1056 }
 0x944   : > { %1479 = vlog2.f32 %v1057_v11 }
 0x94e   : > { %v1480_v12 = vpop.eup %1479 }
 0x94f   : > { %v1059_v14 = vmul.f32 0.6931472, %v1480_v12 }
 0x951   : > { %v1060_v15 = vsub.f32 %v1052_v8, %v1059_v14 }
 0x953   : > { %1061 = vst.msk [vmem:[%s484_s0] sm:$0x1] %vm1048_vm3, %v1060_v15 }
 0x954   : > { %1582 = shalt.err (!%p1579_p6)
}
 0x955   : > { %s1583_s9 = scalar_lea.hbm %s2205_s11, 16  ;;  %s1587_s18 = scalar_lea.hbm %s2307_s28, 32 }
 0x956   : > { %p1584_p8 = scmp.ne.s32.totalorder %s2205_s11, %s1583_s9  ;;  %p1588_p4 = scmp.lt.u32.totalorder %s2205_s11, %s2307_s28 }
 0x957   : > { %p1589_p11 = scmp.lt.u32.totalorder %s1587_s18, %s1583_s9  ;;  %p1591_p3 = scmp.lt.u32.totalorder %s1583_s9, %s2205_s11 }
 0x958   : > { %p1585_p10 = pnand %p1584_p8, %p1813_p12 }
 0x959   : > { %p1590_p13 = por %p1589_p11, %p1588_p4 }
 0x95a   : > { %p1586_p0 = pneg %p1585_p10 }
 0x95b   : > { %p1592_p7 = por %p1591_p3, %p1590_p13 }
 0x95d   : > { %p1593_p9 = pnand %p1592_p7, %p1586_p0 }
 0x95f   : > { %1596 = shalt.err (!%p1593_p9)
}
 0x960   : > { %1414 = dma.vmem_to_hbm [thread:$0]  (%p1813_p12), %s2207_s12, 16, %s2205_s11, %s1063_s29  }
 0x961 PF: > { %s2308_s23 = sld [smem:[#allocation13_spill]]  ;;  %s2309_s30 = sld [smem:[#allocation15_spill]] }
 0x962   : > { %p2311_p5 = scmp.ge.s32.totalorder %s1643_s24, 2 }
 0x967   : > { %s1087_s17 = sand.u32 1, %s2308_s23   ;;  %p2310_p1 = scmp.ne.s32.totalorder %s2309_s30, 0 }
 0x968   : > { %s1088_s0 = scalar_lea.sflag [#allocation4], %s1087_s17 }
 0x969   : > { %p1428_p2 = pnand %p2311_p5, %p2310_p1 }
 0x96b   : > { %1626 = dma.done.wait (!%p1428_p2), %s1088_s0, 16  }
 0x96c   : > { %1628 = vsyncadd (!%p1428_p2), %s1088_s0, 4294967280  ;;  %s2312_s24 = sld [smem:[#allocation16_spill]]  ;;  %s2313_s20 = sld [smem:[#allocation14_spill]] }
 0x96d   : > { %s2314_s23 = sld [smem:[#allocation17_spill]]  ;;  %s2315_s21 = smov %s1635_s22 }
 0x972   : > { %p28_p6 = scmp.ge.s32.totalorder %s2312_s24, 4   ;;  %s2316_s22 = smov %s2313_s20 }
 0x974   :  { %30 = sbr.rel (!%p28_p6) target bundleno = 13 (0xd), region = 130 }
 0x97b   :  { %1092 = vsyncpa [#allocation3], 1 }
 0x97c   :  { %1094 = vsyncpa [#allocation3 + $0x1], 1 }
 0x97d   :  { %1095 = vsyncpa [#allocation6], 1 }
 0x97e   :  { %1097 = vsyncpa [#allocation6 + $0x1], 1 }
 0x97f   :  { %1098 = vsyncpa [#allocation4], 1 }
 0x980   :  { %1100 = vsyncpa [#allocation4 + $0x1], 1 }

</bundles_post_ra>
